<compile_context>
chip_gen: v6e
topology: v6e:2x2x1
jax: 0.10.0
libtpu: 0.0.40
codegen_flags: <defaults>
</compile_context>

<pallas_src>
import math
import functools

import numpy as np
import jax
import jax.numpy as jnp
from jax.experimental import pallas as pl
from jax.experimental.pallas import tpu as pltpu


def _sinusoidal_kernel(t_ref, f_ref, o_ref):
    # t_ref: (TB, 1) f32        — timesteps on the sublane axis.
    # f_ref: (1, half_dim) f32  — frequency table (same block every grid step).
    # o_ref: (TB, channel)      — [sin(t*f) | cos(t*f)] along the lane axis.
    emb = t_ref[...] * f_ref[...]                            # (TB, half_dim) f32
    row = jnp.concatenate([jnp.sin(emb), jnp.cos(emb)], axis=-1)
    o_ref[...] = row.astype(o_ref.dtype)                     # single full store


def _round_up(x, m):
    return ((x + m - 1) // m) * m


def _choose_batch_tile(B, channel, out_bytes):
    """Rows per grid step: ~4 MiB of output tile; >= 2 tiles when B is large."""
    budget_rows = max(8, (4 * 1024 * 1024) // max(1, channel * out_bytes))
    tb = min((budget_rows // 8) * 8, 32768)
    if B > 2 * tb:
        return tb                              # many tiles; VMEM-budget limited
    if B >= 64:
        return _round_up(-(-B // 2), 8)        # exactly 2 tiles -> both v7x TCs
    return _round_up(max(B, 1), 8)             # tiny batch: single tile


def _jax_reference(t, channel):
    # Pure-JAX mirror of the PyTorch forward (also the small-batch fallback).
    half_dim = channel // 2
    scale = math.log(10000.0) / (half_dim - 1)
    freqs = jnp.exp(jnp.arange(half_dim, dtype=jnp.float32) * -scale)
    emb = t.astype(jnp.float32)[:, None] * freqs[None, :]
    return jnp.concatenate([jnp.sin(emb), jnp.cos(emb)], axis=-1)


@functools.partial(jax.jit, static_argnames=("channel", "out_dtype", "use_pallas"))
def sinusoidal_time_embedding(t, channel, out_dtype=jnp.float32, use_pallas=None):
    """t: (B,) timesteps -> (B, channel) sinusoidal embedding (sin || cos)."""
    assert channel % 2 == 0 and channel >= 4, "channel must be even and >= 4"
    half_dim = channel // 2
    B = t.shape[0]

    if use_pallas is None:
        # Below a few thousand rows, pallas_call fixed overhead exceeds the
        # whole computation; let XLA fuse the jnp expression for free.
        use_pallas = B >= 4096
    if not use_pallas:
        return _jax_reference(t, channel).astype(out_dtype)

    # Frequency table: compile-time constant (depends only on `channel`).
    scale = math.log(10000.0) / (half_dim - 1)
    freqs = jnp.asarray(
        np.exp(-scale * np.arange(half_dim, dtype=np.float32)).reshape(1, half_dim))

    out_bytes = jnp.dtype(out_dtype).itemsize
    TB = _choose_batch_tile(B, channel, out_bytes)
    grid = (pl.cdiv(B, TB),)          # ragged last block: Pallas masks OOB rows

    t2d = t.astype(jnp.float32).reshape(B, 1)

    return pl.pallas_call(
        _sinusoidal_kernel,
        out_shape=jax.ShapeDtypeStruct((B, channel), out_dtype),
        grid_spec=pltpu.PrefetchScalarGridSpec(
            num_scalar_prefetch=0,
            grid=grid,
            in_specs=[
                pl.BlockSpec((TB, 1), lambda i: (i, 0)),        # timesteps tile
                pl.BlockSpec((1, half_dim), lambda i: (0, 0)),  # shared freqs
            ],
            out_specs=pl.BlockSpec((TB, channel), lambda i: (i, 0)),
        ),
        # Output tile <= ~4 MiB => double-buffered output (+ tiny inputs) stays
        # well under the default scoped-VMEM limit on v5e/v6e/v7x.
        compiler_params=pltpu.CompilerParams(
            dimension_semantics=("parallel",),   # v7x: shard tiles across 2 TCs
        ),
    )(t2d, freqs)


def _max_abs_err(a, b):
    return float(jnp.max(jnp.abs(a.astype(jnp.float32) - b.astype(jnp.float32))))


if __name__ == "__main__":
    CHANNEL = 32
    # f32 sin/cos of arguments up to ~1e3 differ by ~1e-4 between the kernel's
    # and XLA's range reduction; 5e-3 still catches any structural bug
    # (wrong frequency or sin/cos order produces O(1) errors).
    TOL = 5e-3

    # Case 1: tiny batch — single tile, grid=(1,).
    B1 = 8
    t1 = jax.random.uniform(jax.random.PRNGKey(0), (B1,), dtype=jnp.float32,
                            minval=0.0, maxval=1000.0)
    out1 = jax.block_until_ready(
        sinusoidal_time_embedding(t1, CHANNEL, use_pallas=True))
    ref1 = _jax_reference(t1, CHANNEL)
    assert out1.shape == (B1, CHANNEL)
    err1 = _max_abs_err(out1, ref1)
    assert err1 < TOL, f"mismatch vs reference (B={B1}): max abs err {err1}"

    # Case 2: ragged multi-tile batch — B=1000 -> TB=504, grid=(2,); the second
    # block is masked past row 999 (no pad / slice copies anywhere).
    B2 = 1000
    t2 = jax.random.uniform(jax.random.PRNGKey(0), (B2,), dtype=jnp.float32,
                            minval=0.0, maxval=1000.0)
    out2 = jax.block_until_ready(
        sinusoidal_time_embedding(t2, CHANNEL, use_pallas=True))
    ref2 = _jax_reference(t2, CHANNEL)
    assert out2.shape == (B2, CHANNEL)
    err2 = _max_abs_err(out2, ref2)
    assert err2 < TOL, f"mismatch vs reference (B={B2}): max abs err {err2}"

    print("KERNEL_OK")
</pallas_src>

<mosaic_0001>
module attributes {stable_mosaic.version = 11 : i64} {
  func.func @_sinusoidal_kernel(%arg0: i32, %arg1: memref<8x1xf32, #tpu.memory_space<vmem>>, %arg2: memref<1x16xf32, #tpu.memory_space<vmem>>, %arg3: memref<8x32xf32, #tpu.memory_space<vmem>>) attributes {dimension_semantics = [#tpu.dimension_semantics<parallel>], iteration_bounds = array<i64: 1>, scalar_prefetch = 0 : i64, scratch_operands = 0 : i64, tpu.core_type = #tpu.core_type<tc>, window_params = [{transform_indices = @transform_0, window_bounds = array<i64: 8, 1>}, {pipeline_mode = #tpu.pipeline_mode<synchronous>, transform_indices = @transform_1, window_bounds = array<i64: 1, 16>}, {transform_indices = @transform_2, window_bounds = array<i64: 8, 32>}]} {
    %c0 = arith.constant 0 : index
    %c0_0 = arith.constant 0 : index
    %0 = vector.load %arg1[%c0, %c0_0] : memref<8x1xf32, #tpu.memory_space<vmem>>, vector<8x1xf32>
    %c0_1 = arith.constant 0 : index
    %c0_2 = arith.constant 0 : index
    %1 = vector.load %arg2[%c0_1, %c0_2] : memref<1x16xf32, #tpu.memory_space<vmem>>, vector<1x16xf32>
    %2 = vector.broadcast %0 : vector<8x1xf32> to vector<8x16xf32>
    %3 = vector.broadcast %1 : vector<1x16xf32> to vector<8x16xf32>
    %4 = arith.mulf %2, %3 : vector<8x16xf32>
    %5 = math.sin %4 : vector<8x16xf32>
    %6 = math.cos %4 : vector<8x16xf32>
    %7 = tpu.concatenate %5, %6 in 1 : vector<8x16xf32>, vector<8x16xf32> -> vector<8x32xf32>
    %c0_3 = arith.constant 0 : index
    %c0_4 = arith.constant 0 : index
    %8 = vector.load %arg3[%c0_3, %c0_4] : memref<8x32xf32, #tpu.memory_space<vmem>>, vector<8x32xf32>
    tpu.vector_store %arg3[%c0_3, %c0_4], %7 {strides = array<i32>} : memref<8x32xf32, #tpu.memory_space<vmem>>, vector<8x32xf32>,
    return
  }
  func.func @transform_0(%arg0: i32) -> (i32, i32) {
    %c0_i32 = arith.constant 0 : i32
    %c0_i32_0 = arith.constant 0 : i32
    return %arg0, %c0_i32 : i32, i32
  }
  func.func @transform_1(%arg0: i32) -> (i32, i32) {
    %c0_i32 = arith.constant 0 : i32
    %c0_i32_0 = arith.constant 0 : i32
    %c0_i32_1 = arith.constant 0 : i32
    return %c0_i32, %c0_i32_0 : i32, i32
  }
  func.func @transform_2(%arg0: i32) -> (i32, i32) {
    %c0_i32 = arith.constant 0 : i32
    %c0_i32_0 = arith.constant 0 : i32
    return %arg0, %c0_i32 : i32, i32
  }
}

</mosaic_0001>

<bundles_post_ra>
// kernel: sinusoidal_time_embedding.1
= control target key start
LH: loop header
LB: loop body
LE: loop exit
PB: predicated region body
PF: predicated region fallthrough
CT: control target
= control target key end

     0   :  { %v304_v1 = vmov 0   ;;  %s358_s0 = inlined_call_operand.vmem [shape: f32[8,1], index: 0, kind: input, shape index: {}]   ;;  %s359_s1 = inlined_call_operand.vmem [shape: f32[1,16], index: 1, kind: input, shape index: {}]   ;;  %s360_s2 = inlined_call_operand.hbm [shape: f32[8,32], index: 2, kind: output, shape index: {}]  }
   0x1   :  { %v12_v0 = vld [vmem:[%s358_s0] sm:$0xff]  ;;  %277 = vset.pattern.permute.xlu0 %v304_v1 }
   0x2   :  { %16 = vperm.xlu0 %277, %v12_v0  }
   0x3   :  { %7 = vsyncpa [#allocation3], 0  ;;  %v255_v2 = vld [vmem:[%s359_s1] ss:$0 sm:$0xff]  ;;  %v305_v15 = vmov 683565275  }
   0x4   :  { %v306_v17 = vmov 2475754826   ;;  %v307_v20 = vmov 2131351028   ;;  %v308_v23 = vmov 2102212464  }
   0x5   :  { %v309_v26 = vmov 920167782   ;;  %v310_v29 = vmov 1326507024   ;;  %s311_s0 = smov 16   ;;  %s312_s1 = smov [#allocation2]  }
   0x6   :  { %s247_s13 = sshll.u32 %s312_s1, 4  ;;  %s248_s13 = int_to_ptr.vmem [resolvable:$true] %s247_s13 }
   0x7   :  { %s282_s14 = scalar_lea.vmem %s248_s13, 128  ;;  %p287_p1 = scmp.lt.s32.totalorder %s248_s13, %s248_s13 }
   0x8   :  { %p283_p0 = scmp.ne.s32.totalorder %s248_s13, %s282_s14  ;;  %p288_p2 = scmp.lt.s32.totalorder %s282_s14, %s282_s14 }
   0xa   :  { %p289_p3 = por %p288_p2, %p287_p1 }
   0xc   :  { %p290_p4 = pnand %p289_p3, %p283_p0 }
  0x7d   :  { %v17_v3 = vpop.permute.xlu0 %16 }
  0x7e   :  { %v334_v4 = vmul.f32 %v255_v2, %v17_v3 }
  0x80   :  { %v29_v5 = vand.u32 2139095040, %v334_v4  ;;  %v26_v9 = vand.u32 2147483647, %v334_v4  ;;  %vm28_vm7 = vcmp.lt.s32.totalorder %v334_v4, 0  ;;  %vm118_vm15 = vweird.f32 %v334_v4 }
  0x82   :  { %v30_v6 = vshrl.u32 %v29_v5, 23  ;;  %v33_v12 = vand.u32 8388607, %v26_v9  ;;  %vm27_vm8 = vcmp.le.f32.partialorder %v26_v9, 0.7853982 }
  0x84   :  { %v256_v7 = vadd.s32 4294967169, %v30_v6  ;;  %v34_v31 = vor.u32 8388608, %v33_v12 }
  0x86   :  { %v36_v8 = vadd.s32 1, %v256_v7  ;;  %v74_v45 = vshll.u32 %v34_v31, 8 }
  0x88   :  { %vm37_vm0 = vcmp.gt.s32.totalorder %v36_v8, 0 }
  0x89   :  { %v38_v10 = vsel %vm37_vm0, %v36_v8, 0  ;;  %vm237_vm0 = vcmask 130048  }
  0x8a   :  { %v40_v11 = vand.u32 31, %v38_v10  ;;  %v39_v14 = vshrl.u32 %v38_v10, 5 }
  0x8c   :  { %v41_v13 = vsub.s32 32, %v40_v11  ;;  %v43_v16 = vshll.u32 %v305_v15, %v40_v11  ;;  %v46_v18 = vshll.u32 %v306_v17, %v40_v11  ;;  %v49_v22 = vshll.u32 %v307_v20, %v40_v11 }
  0x8d   :  { %v52_v25 = vshll.u32 %v308_v23, %v40_v11  ;;  %v55_v28 = vshll.u32 %v309_v26, %v40_v11  ;;  %vm58_vm1 = vcmp.lt.s32.totalorder %v39_v14, 1  ;;  %vm61_vm2 = vcmp.lt.s32.totalorder %v39_v14, 4 }
  0x8e   :  { %v44_v19 = vshrl.u32 %v306_v17, %v41_v13  ;;  %v47_v21 = vshrl.u32 %v307_v20, %v41_v13  ;;  %v50_v24 = vshrl.u32 %v308_v23, %v41_v13  ;;  %v53_v27 = vshrl.u32 %v309_v26, %v41_v13 }
  0x8f   :  { %v56_v30 = vshrl.u32 %v310_v29, %v41_v13  ;;  %v42_v40 = vshrl.u32 %v305_v15, %v41_v13  ;;  %vm60_vm3 = vcmp.lt.s32.totalorder %v39_v14, 3  ;;  %vm59_vm4 = vcmp.lt.s32.totalorder %v39_v14, 2 }
  0x90   :  { %v45_v32 = vor.u32 %v44_v19, %v43_v16  ;;  %v48_v33 = vor.u32 %v47_v21, %v46_v18  ;;  %v51_v34 = vor.u32 %v50_v24, %v49_v22  ;;  %v54_v35 = vor.u32 %v53_v27, %v52_v25 }
  0x91   :  { %v57_v36 = vor.u32 %v56_v30, %v55_v28 }
  0x92   :  { %v63_v37 = vsel %vm61_vm2, %v51_v34, 2102212464  ;;  %v66_v38 = vsel %vm58_vm1, %v45_v32, %v48_v33  ;;  %v70_v39 = vsel %vm58_vm1, %v48_v33, %v51_v34  ;;  %v67_v41 = vsel %vm61_vm2, %v54_v35, 920167782 }
  0x93   :  { %v71_v42 = vsel %vm61_vm2, %v57_v36, 1326507024  ;;  %v68_v43 = vsel %vm60_vm3, %v51_v34, %v67_v41  ;;  %v62_v46 = vsel %vm58_vm1, %v42_v40, %v45_v32  ;;  %v64_v47 = vsel %vm60_vm3, %v48_v33, %v63_v37 }
  0x94   :  { %v72_v44 = vsel %vm60_vm3, %v54_v35, %v71_v42  ;;  %v69_v48 = vsel %vm59_vm4, %v66_v38, %v68_v43  ;;  %v65_v54 = vsel %vm59_vm4, %v62_v46, %v64_v47  ;;  %vm239_vm1 = vcmask 261120  }
  0x95   :  { %v73_v49 = vsel %vm59_vm4, %v70_v39, %v72_v44  ;;  %v343_v52 = vmul.u32.u64.low %v74_v45, %v69_v48  ;;  %v344_v53 = vmul.u32.u64.high %v74_v45, %v69_v48, %v343_v52  ;;  %v81_v56 = vmul.u32 %v74_v45, %v65_v54 }
  0x96   :  { %v340_v50 = vmul.u32.u64.low %v74_v45, %v73_v49  ;;  %v341_v51 = vmul.u32.u64.high %v74_v45, %v73_v49, %v340_v50 }
  0x97   :  { %v84_v55 = vadd.s32 1, %v344_v53 }
  0x98   :  { %vm83_vm5 = vc.u32 %v341_v51, %v343_v52  ;;  %v82_v5 = vadd.s32 %v343_v52, %v341_v51 }
  0x99   :  { %v85_v57 = vsel %vm83_vm5, %v84_v55, %v344_v53 }
  0x9a   :  { %v86_v58 = vadd.s32 %v85_v57, %v81_v56 }
  0x9c   :  { %v87_v59 = vadd.s32 536870912, %v86_v58 }
  0x9e   :  { %v88_v60 = vshrl.u32 %v87_v59, 30 }
  0xa0   :  { %v89_v61 = vshll.u32 %v88_v60, 30  ;;  %v112_v19 = vsub.s32 4, %v88_v60 }
  0xa2   :  { %v90_v62 = vsub.s32 %v86_v58, %v89_v61  ;;  %v113_v22 = vsel %vm28_vm7, %v112_v19, %v88_v60 }
  0xa3   :  { %v115_v23 = vsel %vm27_vm8, 0, %v113_v22 }
  0xa4   :  { %v92_v63 = vsub.s32 0, %v90_v62  ;;  %v119_v24 = vadd.s32 3, %v115_v23  ;;  %v223_v26 = vand.u32 3, %v115_v23 }
  0xa6   :  { %v257_v0 = vmin.u32 %v92_v63, %v90_v62  ;;  %v120_v25 = vand.u32 3, %v119_v24  ;;  %vm228_vm10 = vcmp.eq.s32.totalorder %v223_v26, 2  ;;  %vm225_vm12 = vcmp.eq.s32.totalorder %v223_v26, 0 }
  0xa7   :  { %vm224_vm14 = vcmp.lt.s32.totalorder %v223_v26, 2 }
  0xa8   :  { %v94_v1 = vclz %v257_v0  ;;  %vm125_vm9 = vcmp.eq.s32.totalorder %v120_v25, 2  ;;  %vm122_vm11 = vcmp.eq.s32.totalorder %v120_v25, 0  ;;  %vm121_vm13 = vcmp.lt.s32.totalorder %v120_v25, 2 }
  0xaa   :  { %v258_v2 = vadd.s32 4294967294, %v94_v1 }
  0xac   :  { %vm259_vm6 = vcmp.lt.s32.totalorder %v258_v2, 0 }
  0xad   :  { %v97_v3 = vsel %vm259_vm6, 0, %v258_v2 }
  0xae   :  { %v98_v6 = vsub.s32 32, %v97_v3  ;;  %v102_v7 = vsub.s32 4294967266, %v97_v3  ;;  %v99_v8 = vshll.u32 %v90_v62, %v97_v3 }
  0xb0   :  { %v100_v10 = vshrl.u32 %v82_v5, %v98_v6  ;;  %v103_v11 = vadd.s32 127, %v102_v7 }
  0xb2   :  { %v101_v12 = vor.u32 %v100_v10, %v99_v8  ;;  %v104_v13 = vshll.u32 %v103_v11, 23 }
  0xb4   :  { %v105_v14 = vor.u32 4788187, %v104_v13  ;;  %v108_v16 = vcvt.s32.f32 %v101_v12 }
  0xb6   :  { %v106_v15 = vand.u32 2147483647, %v105_v14 }
  0xb8   :  { %v109_v17 = vmul.f32 %v108_v16, %v106_v15 }
  0xba   :  { %v110_v18 = vxor.u32 2147483648, %v109_v17 }
  0xbc   :  { %v111_v20 = vsel %vm28_vm7, %v110_v18, %v109_v17 }
  0xbd   :  { %v114_v21 = vsel %vm27_vm8, %v334_v4, %v111_v20 }
  0xbe   :  { %278 = vcosq.f32 %v114_v21 }
  0xbf   :  { %280 = vsinq.f32 %v114_v21 }
  0xcb   :  { %v279_v27 = vpop.eup %278 }
  0xcc   :  { %v281_v28 = vpop.eup %280  ;;  %v126_v29 = vxor.u32 2147483648, %v279_v27 }
  0xcd   :  { %v123_v30 = vxor.u32 2147483648, %v281_v28 }
  0xce   :  { %v230_v31 = vsel %vm228_vm10, %v126_v29, %v281_v28  ;;  %v127_v32 = vsel %vm125_vm9, %v126_v29, %v281_v28 }
  0xcf   :  { %v227_v9 = vsel %vm225_vm12, %v279_v27, %v123_v30  ;;  %v124_v33 = vsel %vm122_vm11, %v279_v27, %v123_v30 }
  0xd0   :  { %v231_v34 = vsel %vm224_vm14, %v227_v9, %v230_v31  ;;  %v128_v35 = vsel %vm121_vm13, %v124_v33, %v127_v32 }
  0xd1   :  { %v232_v36 = vsel %vm118_vm15, nan, %v231_v34  ;;  %v129_v37 = vsel %vm118_vm15, nan, %v128_v35 }
  0xd2   :  { %234 = vrot.lane.b32.xlu0 %v232_v36, %s311_s0 }
 0x144   :  { %v235_v38 = vpop.permute.xlu0 %234 }
 0x145   :  { %v238_v39 = vsel %vm237_vm0, %v129_v37, %v235_v38 }
 0x146   :  { %240 = vst.msk [vmem:[#allocation2] sm:$0xff] %vm239_vm1, %v238_v39 }
 0x147   :  { %293 = shalt.err (!%p290_p4)
}
 0x148   :  { %250 = dma.vmem_to_hbm [thread:$0]  %s248_s13, 128, %s360_s2, [#allocation3]  }
 0x149   :  { %302 = dma.done.wait [#allocation3], 128  }
 0x14a   :  { %303 = vsyncadd [#allocation3], 4294967168 }
 0x14b   :  { %254 = vsyncpa [#allocation3], 1 }

</bundles_post_ra>
